<compile_context>
chip_gen: v7x
topology: tpu7x:2x2x1
jax: 0.10.0
libtpu: 0.0.40
codegen_flags: <defaults>
</compile_context>

<pallas_src>
import numpy as np
import jax
import jax.numpy as jnp
from jax.experimental import pallas as pl
from jax.experimental.pallas import tpu as pltpu


def bert_pool_kernel(pool_ref, hs_ref, out_ref):
    # pool_ref: (W, L*T) bf16 -- pooling matrix with the 1/L layer mean folded in
    # hs_ref:   (L*T, tH) bf16 -- last-4 BERT layers, flattened along tokens
    # out_ref:  (W, tH)   f32  -- lane-dense word-embedding tile
    out_ref[...] = jnp.dot(pool_ref[...], hs_ref[...],
                           preferred_element_type=jnp.float32)


def bert_graph_pool(hs, pool, *, h_tile=None):
    """hs: [B, L, T, H] float, pool: [B, W, T] f32 -> [B, W, H] f32.

    out[b, w, h] = sum_t pool[b, w, t] * mean_l hs[b, l, t, h]
    """
    B, L, T, H = hs.shape
    W = pool.shape[1]
    if h_tile is None:
        h_tile = min(H, 512)
    assert H % h_tile == 0, "H must be divisible by the H tile"

    # Fold the 1/L layer mean into the pooling matrix -> single MXU contraction
    # over K = L*T (the VPU layer-mean and its (T,H) intermediate disappear).
    hs_flat = hs.reshape(B, L * T, H).astype(jnp.bfloat16)
    pool_flat = (jnp.broadcast_to(pool[:, :, None, :], (B, W, L, T))
                 .reshape(B, W, L * T) * (1.0 / L)).astype(jnp.bfloat16)

    # Explicit scoped-VMEM budget with headroom: double-buffered blocks + 4 MiB,
    # clamped to [16 MiB, 64 MiB] so it is safe on v5e (16 MiB default scoped
    # limit) and never exceeds v7x's 64 MiB physical VMEM.
    blk_bytes = (L * T * h_tile * hs_flat.dtype.itemsize      # hs block
                 + W * L * T * pool_flat.dtype.itemsize       # pool block
                 + W * h_tile * 4)                            # out block (f32)
    vmem_limit = int(min(64 << 20, max(2 * blk_bytes + (4 << 20), 16 << 20)))

    return pl.pallas_call(
        bert_pool_kernel,
        out_shape=jax.ShapeDtypeStruct((B, W, H), jnp.float32),
        grid_spec=pl.GridSpec(
            grid=(B, H // h_tile),
            in_specs=[
                pl.BlockSpec((None, W, L * T), lambda b, h: (b, 0, 0)),
                pl.BlockSpec((None, L * T, h_tile), lambda b, h: (b, 0, h)),
            ],
            out_specs=pl.BlockSpec((None, W, h_tile), lambda b, h: (b, 0, h)),
        ),
        compiler_params=pltpu.CompilerParams(
            dimension_semantics=("parallel", "parallel"),
            vmem_limit_bytes=vmem_limit),
    )(pool_flat, hs_flat)


def build_pool_matrix(word_ids, num_words, W, T):
    """Mirror of the per-graph python loop in BERTGraphModel.forward.

    Row 0 selects token 0 (the CLS embedding); row j+1 averages the token
    embeddings whose tokenizer word_id == j; a word with no tokens keeps a
    zero row (== torch.zeros in the reference); padded word rows stay zero.
    """
    M = np.zeros((W, T), dtype=np.float32)
    M[0, 0] = 1.0  # cls_emb = token_embeds[0]
    for j in range(num_words):
        idx = [k for k, wid in enumerate(word_ids) if wid == j]
        if idx:
            M[j + 1, idx] = 1.0 / float(len(idx))
    return M


def make_word_ids(num_words, T):
    """Deterministic synthetic tokenizer word_ids (None == special/pad)."""
    word_ids = [None]                      # CLS
    for j in range(num_words):
        word_ids.extend([j] * (1 + (j % 3)))   # word j -> 1..3 subword tokens
    word_ids.extend([None] * (T - len(word_ids)))
    return word_ids[:T]


if __name__ == "__main__":
    # Small but (8,128)-aligned shapes: lane-dense output (H % 128 == 0),
    # contraction K = L*T = 512, W a multiple of 8.
    B, L, T, H, W = 2, 4, 128, 256, 16
    key = jax.random.PRNGKey(0)

    # Synthetic "outputs.hidden_states[-4:]" from the (injected) BERT model,
    # fed to the kernel in bf16.
    hs = jax.random.normal(key, (B, L, T, H), dtype=jnp.float32)
    hs_bf16 = hs.astype(jnp.bfloat16)

    # Synthetic tokenizer word_ids per graph and per-graph word counts.
    num_words_list = [7, 5]
    word_ids_list = [make_word_ids(n, T) for n in num_words_list]

    pool_np = np.stack([
        build_pool_matrix(word_ids_list[i], num_words_list[i], W, T)
        for i in range(B)
    ])
    pool = jnp.asarray(pool_np)

    # Pallas kernel: fused (folded) layer-mean + subword->word pooling.
    x_padded = bert_graph_pool(hs_bf16, pool, h_tile=128)
    x_padded = jax.block_until_ready(x_padded)

    # Glue: stack/cat semantics of the reference (x_full = torch.cat(x_list)).
    x_full = jnp.concatenate(
        [x_padded[i, : num_words_list[i] + 1] for i in range(B)], axis=0)
    x_full = jax.block_until_ready(x_full)

    # Pure-JAX reference of the module's own compute (f32 math on the bf16 hs).
    mean4_ref = jnp.mean(hs_bf16.astype(jnp.float32), axis=1)      # [B, T, H]
    ref_padded = jnp.einsum("bwt,bth->bwh", pool, mean4_ref)
    ref_full = jnp.concatenate(
        [ref_padded[i, : num_words_list[i] + 1] for i in range(B)], axis=0)

    assert x_full.shape == (sum(n + 1 for n in num_words_list), H)
    np.testing.assert_allclose(np.asarray(x_full), np.asarray(ref_full),
                               rtol=2e-2, atol=2e-2)

    # TODO(synk): gnn_model / bert_model / tokenizer are injected submodules with
    # unspecified architectures; batch.x (= x_full) is the module's own output here.
    print("KERNEL_OK")
</pallas_src>

<mosaic_0001>
module attributes {stable_mosaic.version = 11 : i64} {
  func.func @bert_pool_kernel(%arg0: i32, %arg1: i32, %arg2: memref<1x16x512xbf16, #tpu.memory_space<vmem>>, %arg3: memref<1x512x128xbf16, #tpu.memory_space<vmem>>, %arg4: memref<1x16x128xf32, #tpu.memory_space<vmem>>) attributes {dimension_semantics = [#tpu.dimension_semantics<parallel>, #tpu.dimension_semantics<parallel>], iteration_bounds = array<i64: 2, 2>, scalar_prefetch = 0 : i64, scratch_operands = 0 : i64, tpu.core_type = #tpu.core_type<tc>, window_params = [{transform_indices = @transform_0, window_bounds = array<i64: 1, 16, 512>}, {transform_indices = @transform_1, window_bounds = array<i64: 1, 512, 128>}, {transform_indices = @transform_2, window_bounds = array<i64: 1, 16, 128>}]} {
    %c0 = arith.constant 0 : index
    %c0_0 = arith.constant 0 : index
    %c0_1 = arith.constant 0 : index
    %0 = vector.load %arg2[%c0, %c0_0, %c0_1] : memref<1x16x512xbf16, #tpu.memory_space<vmem>>, vector<1x16x512xbf16>
    %1 = vector.shape_cast %0 : vector<1x16x512xbf16> to vector<16x512xbf16>
    %c0_2 = arith.constant 0 : index
    %c0_3 = arith.constant 0 : index
    %c0_4 = arith.constant 0 : index
    %2 = vector.load %arg3[%c0_2, %c0_3, %c0_4] : memref<1x512x128xbf16, #tpu.memory_space<vmem>>, vector<1x512x128xbf16>
    %3 = vector.shape_cast %2 : vector<1x512x128xbf16> to vector<512x128xbf16>
    %cst = arith.constant dense<0.000000e+00> : vector<16x128xf32>
    %4 = tpu.matmul %1, %3, %cst {dimension_numbers = #tpu.dot_dimension_numbers<[1], [0], [0], [1], [0, 0, 1, 1], [], []>} : vector<16x512xbf16>, vector<512x128xbf16>, vector<16x128xf32> -> vector<16x128xf32>
    %c0_5 = arith.constant 0 : index
    %c0_6 = arith.constant 0 : index
    %c0_7 = arith.constant 0 : index
    %5 = vector.load %arg4[%c0_5, %c0_6, %c0_7] : memref<1x16x128xf32, #tpu.memory_space<vmem>>, vector<1x16x128xf32>
    %6 = vector.shape_cast %5 : vector<1x16x128xf32> to vector<16x128xf32>
    %7 = vector.shape_cast %4 : vector<16x128xf32> to vector<1x16x128xf32>
    tpu.vector_store %arg4[%c0_5, %c0_6, %c0_7], %7 {strides = array<i32>} : memref<1x16x128xf32, #tpu.memory_space<vmem>>, vector<1x16x128xf32>,
    return
  }
  func.func @transform_0(%arg0: i32, %arg1: i32) -> (i32, i32, i32) {
    %c0_i32 = arith.constant 0 : i32
    %c0_i32_0 = arith.constant 0 : i32
    %c0_i32_1 = arith.constant 0 : i32
    return %arg0, %c0_i32, %c0_i32_0 : i32, i32, i32
  }
  func.func @transform_1(%arg0: i32, %arg1: i32) -> (i32, i32, i32) {
    %c0_i32 = arith.constant 0 : i32
    %c0_i32_0 = arith.constant 0 : i32
    return %arg0, %c0_i32, %arg1 : i32, i32, i32
  }
  func.func @transform_2(%arg0: i32, %arg1: i32) -> (i32, i32, i32) {
    %c0_i32 = arith.constant 0 : i32
    %c0_i32_0 = arith.constant 0 : i32
    return %arg0, %c0_i32, %arg1 : i32, i32, i32
  }
}

</mosaic_0001>

<bundles_post_ra>
// kernel: tpu_custom_call.1
= control target key start
LH: loop header
LB: loop body
LE: loop exit
PB: predicated region body
PF: predicated region fallthrough
CT: control target
= control target key end

     0   :  { %s1524_s0 = inlined_call_operand.hbm [shape: bf16[2,16,512], index: 0, kind: input, shape index: {}]   ;;  %s1525_s1 = inlined_call_operand.hbm [shape: bf16[2,512,256], index: 1, kind: input, shape index: {}]   ;;  %s1526_s2 = inlined_call_operand.hbm [shape: f32[2,16,256], index: 2, kind: output, shape index: {}]  }
   0x1   :  { %1538 = sst [smem:[#allocation16_spill]] %s1524_s0 }
   0x2   :  { %1539 = sst [smem:[#allocation17_spill]] %s1526_s2 }
   0x3   :  { %7 = vsyncpa [#allocation3], 0 }
   0x4   :  { %9 = vsyncpa [#allocation3 + $0x1], 0 }
   0x5   :  { %10 = vsyncpa [#allocation6], 0 }
   0x6   :  { %12 = vsyncpa [#allocation6 + $0x1], 0 }
   0x7   :  { %13 = vsyncpa [#allocation4], 0 }
   0x8   :  { %15 = vsyncpa [#allocation4 + $0x1], 0  ;;  %s1177_s9 = smov 0   ;;  %s1179_s10 = smov 0  }
   0x9   :  { %s1181_s11 = smov 0   ;;  %s1183_s12 = smov 0  }
   0xa   :  { %s1185_s13 = smov 0   ;;  %s1187_s14 = smov 0  }
   0xb   :  { %s1189_s15 = smov 0   ;;  %s1191_s16 = smov 0  }
   0xc   :  { %s1193_s17 = smov 0   ;;  %s1195_s18 = smov 0  }
   0xd   :  { %s1197_s19 = smov 0  }
   0xe LB: > { %1540 = sst [smem:[#allocation11_spill]] %s1109_s9  ;;  %s710_s20 = sadd.s32 4294967295, %s1149_s19   ;;  %s1149_s19 = sphi %s1197_s19, %s21_s19   ;;  %s1145_s18 = sphi %s1195_s18, %s1577_s18   ;;  %s1141_s17 = sphi %s1193_s17, %s1576_s17   ;;  %s1137_s16 = sphi %s1191_s16, %s1575_s16   ;;  %s1133_s15 = sphi %s1189_s15, %s1574_s15   ;;  %s1129_s14 = sphi %s1187_s14, %s1573_s14   ;;  %s1125_s13 = sphi %s1185_s13, %s1572_s13   ;;  %s1121_s12 = sphi %s1183_s12, %s1571_s12   ;;  %s1117_s11 = sphi %s1181_s11, %s1570_s11   ;;  %s1113_s10 = sphi %s1179_s10, %s1569_s10   ;;  %s1109_s9 = sphi %s1177_s9, %s1568_s9  }
   0xf   : > { %1541 = sst [smem:[#allocation12_spill]] %s1133_s15  ;;  %s33_s21 = sadd.s32 1, %s1145_s18 }
  0x10   : > { %s40_s22 = sadd.s32 1, %s1129_s14  ;;  %p47_p0 = scmp.ne.s32.totalorder %s1129_s14, %s1125_s13 }
  0x11   : > { %p1528_p1 = scmp.eq.s32.totalorder %s1149_s19, 0  ;;  %p53_p2 = scmp.ne.s32.totalorder %s1125_s13, %s1121_s12 }
  0x12   : > { %p1239_p3 = scmp.eq.s32.totalorder %s710_s20, 0  ;;  %p1527_p5 = scmp.lt.s32.totalorder %s1149_s19, 4 }
  0x13   : > { %p49_p4 = por %p1528_p1, %p47_p0  ;;  %s133_s25 = sand.u32 1, %s1129_s14  }
  0x14   : > { %p1248_p6 = por %p1239_p3, %p53_p2  ;;  %s714_s26 = sshll.u32 %s133_s25, 5 }
  0x15   : > { %s765_s27 = sshll.u32 %s1145_s18, 9  ;;  %s1544_s0 = sld [smem:[#allocation16_spill]] }
  0x16   : > { %s1543_s24 = scalar_select %p1248_p6, 1, 0 }
  0x17   : > { %s137_s3 = scalar_lea.vmem [#allocation2], %s714_s26  ;;  %p1263_p7 = pnand %p1527_p5, %p49_p4 }
  0x18   : > { %s144_s4 = sshll.u32 %s137_s3, 4  ;;  %s1268_s6 = scalar_lea.sflag [#allocation3], %s133_s25  ;;  %s1259_s4 = int_to_ptr.vmem [resolvable:$true] %s144_s4 }
  0x19   : > { %p965_p10 = pneg %p1263_p7 }
  0x1b   : > { %s1257_s30 = scalar_lea.hbm %s1544_s0, %s765_s27  ;;  %s968_s26 = scalar_lea.hbm %s1544_s0, 1024 }
  0x1c   : > { %s963_s7 = scalar_lea.hbm %s1257_s30, 512  ;;  %p969_p13 = scmp.lt.u32.totalorder %s1257_s30, %s1544_s0 }
  0x1d   : > { %p964_p9 = scmp.ne.s32.totalorder %s1257_s30, %s963_s7  ;;  %p970_p0 = scmp.lt.u32.totalorder %s968_s26, %s963_s7 }
  0x1e   : > { %p972_p4 = scmp.lt.u32.totalorder %s963_s7, %s1257_s30 }
  0x1f   : > { %p966_p11 = pnand %p965_p10, %p964_p9  ;;  %p971_p2 = por %p970_p0, %p969_p13 }
  0x21   : > { %p967_p12 = pneg %p966_p11  ;;  %p973_p5 = por %p972_p4, %p971_p2 }
  0x23   : > { %p974_p1 = pnand %p973_p5, %p967_p12 }
  0x25   : > { %977 = shalt.err (!%p974_p1)
}
  0x26   : > { %s978_s25 = scalar_lea.vmem %s1259_s4, 512  ;;  %s1151_s29 = smov [#allocation2]  }
  0x27   : > { %p979_p9 = scmp.ne.s32.totalorder %s1259_s4, %s978_s25  ;;  %s983_s3 = sshll.u32 %s1151_s29, 4  ;;  %s984_s3 = int_to_ptr.vmem [resolvable:$false] %s983_s3 }
  0x28   : > { %s985_s8 = scalar_lea.vmem %s984_s3, 1024  ;;  %p986_p6 = scmp.lt.s32.totalorder %s1259_s4, %s984_s3 }
  0x29   : > { %p981_p11 = pnand %p979_p9, %p965_p10  ;;  %p987_p13 = scmp.lt.s32.totalorder %s985_s8, %s978_s25 }
  0x2b   : > { %p982_p8 = pneg %p981_p11  ;;  %p988_p0 = por %p987_p13, %p986_p6 }
  0x2d   : > { %p989_p2 = pnand %p988_p0, %p982_p8 }
  0x2f   : > { %992 = shalt.err (!%p989_p2)
}
  0x30   : > { %s1152_s7 = smov 256   ;;  %s1153_s12 = smov 16  }
  0x31   : > { %819 = dma.hbm_to_vmem [thread:$0]  (!%p1263_p7), %s1257_s30, 512, %s1259_s4, %s1268_s6, %s1152_s7, %s1152_s7, %s1153_s12  }
  0x32   : > { %p174_p1 = scmp.lt.s32.totalorder %s1149_s19, 5  ;;  %p1546_p5 = scmp.ge.s32.totalorder %s1149_s19, 1 }
  0x33   : > { %s711_s27 = sadd.s32 4294967294, %s1149_s19   ;;  %s30_s28 = sadd.s32 1, %s1141_s17 }
  0x34   : > { %p1299_p6 = pnand %p1546_p5, %p174_p1  ;;  %p31_p8 = scmp.ge.s32.totalorder %s30_s28, 2 }
  0x35   : > { %s68_s25 = sadd.s32 1, %s1117_s11  ;;  %p75_p10 = scmp.ne.s32.totalorder %s1117_s11, %s1113_s10 }
  0x36   : > { %p81_p12 = scmp.ne.s32.totalorder %s1113_s10, %s1109_s9  ;;  %s1579_s28 = smov (%p31_p8, %s30_s28), 0 }
  0x37   : > { %1548 = sst [smem:[#allocation13_spill]] %s1579_s28  ;;  %s1581_s21 = smov (!%p31_p8, %s33_s21), %s1145_s18 }
  0x38   : > { %s64_s30 = ssub.s32 %s1141_s17, %s1579_s28  ;;  %p1549_p7 = scmp.eq.s32.totalorder %s1149_s19, 0 }
  0x39   : > { %p35_p9 = scmp.ge.s32.totalorder %s1581_s21, 2  ;;  %p1325_p11 = por %p81_p12, %p1239_p3 }
  0x3a   : > { %p1319_p4 = por %p75_p10, %p1549_p7  ;;  %p107_p13 = scmp.eq.s32.totalorder %s710_s20, 3 }
  0x3b   : > { %s1551_s5 = scalar_select %p1325_p11, 1, 0 }
  0x3c   : > { %p113_p0 = scmp.eq.s32.totalorder %s711_s27, 3  ;;  %s1583_s21 = smov (%p35_p9, %s1581_s21), 0 }
  0x3d   : > { %p1333_p2 = por %p107_p13, %p75_p10  ;;  %s37_s23 = ssub.s32 %s1145_s18, %s1583_s21 }
  0x3e   : > { %p1337_p1 = por %p113_p0, %p81_p12  ;;  %s154_s3 = sand.u32 1, %s1117_s11  }
  0x3f   : > { %s1552_s6 = scalar_select %p1333_p2, 1, 0 }
  0x40   : > { %s1554_s29 = scalar_select %p1337_p1, 1, 0 }
  0x41   : > { %1553 = sst [smem:[#allocation14_spill]] %s1552_s6  ;;  %p38_p3 = scmp.eq.s32.totalorder %s37_s23, 0 }
  0x42   : > { %1555 = sst [smem:[#allocation15_spill]] %s1554_s29  ;;  %s65_s8 = sor.u32 %s64_s30, %s37_s23 }
  0x43   : > { %p66_p5 = scmp.eq.s32.totalorder %s65_s8, 0  ;;  %s717_s12 = sshll.u32 %s154_s3, 8 }
  0x44   : > { %s1347_s20 = scalar_select %p38_p3, %s1129_s14, %s40_s22  }
  0x45   : > { %s1350_s7 = scalar_select %p66_p5, %s1117_s11, %s68_s25  }
  0x46   : > { %s718_s27 = sshll.u32 %s1145_s18, 7  ;;  %s158_s9 = scalar_lea.vmem [#allocation5], %s717_s12 }
  0x47   : > { %s163_s0 = sadd.s32 %s1141_s17, %s718_s27  ;;  %s166_s2 = sshll.u32 %s158_s9, 4  ;;  %s1359_s2 = int_to_ptr.vmem [resolvable:$true] %s166_s2 }
  0x48   : > { %s719_s28 = sshll.u32 %s163_s0, 6  ;;  %p1556_p8 = scmp.lt.s32.totalorder %s1149_s19, 4 }
  0x49   : > { %s1357_s15 = scalar_lea.hbm %s1525_s1, %s719_s28  ;;  %s1369_s0 = scalar_lea.sflag [#allocation6], %s154_s3 }
  0x4a   : > { %p1365_p10 = pnand %p1556_p8, %p1319_p4  ;;  %s993_s9 = scalar_lea.hbm %s1357_s15, 4096 }
  0x4b   : > { %p994_p12 = scmp.ne.s32.totalorder %s1357_s15, %s993_s9  ;;  %s998_s30 = scalar_lea.hbm %s1525_s1, 16384 }
  0x4c   : > { %p995_p7 = pneg %p1365_p10  ;;  %p999_p4 = scmp.lt.u32.totalorder %s1357_s15, %s1525_s1 }
  0x4d   : > { %p1000_p0 = scmp.lt.u32.totalorder %s998_s30, %s993_s9  ;;  %p1002_p5 = scmp.lt.u32.totalorder %s993_s9, %s1357_s15 }
  0x4e   : > { %p996_p9 = pnand %p995_p7, %p994_p12 }
  0x4f   : > { %p1001_p3 = por %p1000_p0, %p999_p4 }
  0x50   : > { %p997_p13 = pneg %p996_p9 }
  0x51   : > { %p1003_p8 = por %p1002_p5, %p1001_p3 }
  0x53   : > { %p1004_p1 = pnand %p1003_p8, %p997_p13 }
  0x55   : > { %1007 = shalt.err (!%p1004_p1)
}
  0x56   : > { %s1008_s29 = scalar_lea.vmem %s1359_s2, 4096  ;;  %s1154_s23 = smov [#allocation5]  }
  0x57   : > { %p1009_p12 = scmp.ne.s32.totalorder %s1359_s2, %s1008_s29  ;;  %s1013_s3 = sshll.u32 %s1154_s23, 4  ;;  %s1014_s3 = int_to_ptr.vmem [resolvable:$false] %s1013_s3 }
  0x58   : > { %s1015_s8 = scalar_lea.vmem %s1014_s3, 8192  ;;  %p1016_p11 = scmp.lt.s32.totalorder %s1359_s2, %s1014_s3 }
  0x59   : > { %p1011_p9 = pnand %p1009_p12, %p995_p7  ;;  %p1017_p4 = scmp.lt.s32.totalorder %s1015_s8, %s1008_s29 }
  0x5b   : > { %p1012_p2 = pneg %p1011_p9  ;;  %p1018_p0 = por %p1017_p4, %p1016_p11 }
  0x5d   : > { %p1019_p3 = pnand %p1018_p0, %p1012_p2 }
  0x5f   : > { %1022 = shalt.err (!%p1019_p3)
}
  0x60   : > { %s1155_s12 = smov 128   ;;  %s1156_s27 = smov 64  }
  0x61   : > { %s1157_s9 = smov 4   ;;  %178 = sbr.rel (%p1299_p6) target bundleno = 379 (0x17b), region = 28 }
  0x62   : > { %822 = dma.hbm_to_vmem [thread:$0]  (!%p1365_p10), %s1357_s15, 4096, %s1359_s2, %s1369_s0, %s1155_s12, %s1156_s27, %s1157_s9  }
  0x63   : > { %s180_s28 = sand.u32 (!%p1299_p6), 1, %s1125_s13   ;;  %p1558_p11 = scmp.ne.s32.totalorder (!%p1299_p6), %s1543_s24, 0 }
  0x64   : > { %s721_s25 = sshll.u32 (!%p1299_p6), %s180_s28, 5  ;;  %s181_s30 = scalar_lea.sflag (!%p1299_p6), [#allocation3], %s180_s28 }
  0x65   : > { %s1400_s4 = scalar_lea.vmem (!%p1299_p6), [#allocation2], %s721_s25 }
  0x68   : > { %1096 = dma.done.wait (%p1558_p11), %s181_s30, 512  }
  0x69   : > { %1098 = vsyncadd (%p1558_p11), %s181_s30, 4294966784  ;;  %s1407_s6 = sand.u32 1, %s1113_s10   ;;  %p1559_p6 = scmp.ne.s32.totalorder %s1551_s5, 0 }
  0x6a   : > { %s722_s2 = sshll.u32 %s1407_s6, 8  ;;  %s190_s15 = scalar_lea.sflag [#allocation6], %s1407_s6 }
  0x6b   : > { %s1411_s26 = scalar_lea.vmem [#allocation5], %s722_s2 }
  0x6c   : > { %1100 = dma.done.wait (%p1559_p6), %s190_s15, 4096  }
  0x6d   : > { %1102 = vsyncadd (%p1559_p6), %s190_s15, 4294963200  ;;  %v925_v0 = vld [vmem:[%s1411_s26 + $0x40] sm:$0xff]   ;;  %v929_v4 = vld [vmem:[%s1411_s26 + $0x48] sm:$0xff]   ;;  %s1560_s24 = sld [smem:[#allocation12_spill]]  ;;  %s723_s5 = sshll.u32 %s1407_s6, 4 }
  0x6e   : > { %v926_v1 = vld [vmem:[%s1411_s26 + $0xc0] sm:$0xff]   ;;  %766 = vmatprep.subr.bf16.mxu0 %v925_v0  ;;  %v930_v5 = vld [vmem:[%s1411_s26 + $0xc8] sm:$0xff]   ;;  %v933_v8 = vld [vmem:[%s1411_s26 + $0x50] sm:$0xff]   ;;  %s761_s22 = sshll.u32 %s1137_s16, 2  ;;  %s218_s29 = scalar_lea.vmem [#allocation7], %s723_s5 }
  0x6f   : > { %v927_v2 = vld [vmem:[%s1411_s26] sm:$0xff]   ;;  %788 = vmatprep.subr.bf16.mxu1 %v926_v1  ;;  %v931_v6 = vld [vmem:[%s1411_s26 + $0x8] sm:$0xff]   ;;  %v934_v9 = vld [vmem:[%s1411_s26 + $0xd0] sm:$0xff]   ;;  %s599_s23 = sshll.u32 %s218_s29, 4  ;;  %s1561_s3 = sld [smem:[#allocation14_spill]]  ;;  %s1456_s23 = int_to_ptr.vmem [resolvable:$true] %s599_s23 }
  0x70   : > { %v928_v3 = vld [vmem:[%s1411_s26 + $0x80] sm:$0xff]   ;;  %767 = vmatpush3.bf16.msra.mxu0 %v927_v2  ;;  %v932_v7 = vld [vmem:[%s1411_s26 + $0x88] sm:$0xff]   ;;  %v935_v10 = vld [vmem:[%s1411_s26 + $0x10] sm:$0xff]   ;;  %s1562_s27 = sld [smem:[#allocation17_spill]]  ;;  %s585_s28 = scalar_lea.sflag [#allocation4], %s1407_s6 }
  0x71   : > { %789 = vmatpush3.bf16.msra.mxu1 %v928_v3  ;;  %768 = vmatprep.subr.bf16.mxu0 %v929_v4  ;;  %v936_v11 = vld [vmem:[%s1411_s26 + $0x90] sm:$0xff]   ;;  %v937_v12 = vld [vmem:[%s1411_s26 + $0x58] sm:$0xff]   ;;  %v941_v16 = vld [vmem:[%s1411_s26 + $0x60] sm:$0xff]   ;;  %s1023_s25 = scalar_lea.vmem %s1456_s23, 256  ;;  %s1158_s30 = smov [#allocation7]  }
  0x72   : > { %790 = vmatprep.subr.bf16.mxu1 %v930_v5  ;;  %v938_v13 = vld [vmem:[%s1411_s26 + $0xd8] sm:$0xff]   ;;  %v942_v17 = vld [vmem:[%s1411_s26 + $0xe0] sm:$0xff]   ;;  %v945_v20 = vld [vmem:[%s1411_s26 + $0x68] sm:$0xff]   ;;  %p1024_p2 = scmp.ne.s32.totalorder %s1456_s23, %s1023_s25 }
  0x73   : > { %v939_v14 = vld [vmem:[%s1411_s26 + $0x18] sm:$0xff]   ;;  %v943_v18 = vld [vmem:[%s1411_s26 + $0x20] sm:$0xff]   ;;  %v946_v21 = vld [vmem:[%s1411_s26 + $0xe8] sm:$0xff]   ;;  %s596_s0 = sadd.s32 %s1560_s24, %s761_s22 }
  0x74   : > { %769 = vmatpush3.bf16.msra.mxu0 %v931_v6  ;;  %v940_v15 = vld [vmem:[%s1411_s26 + $0x98] sm:$0xff]   ;;  %v944_v19 = vld [vmem:[%s1411_s26 + $0xa0] sm:$0xff]   ;;  %v947_v22 = vld [vmem:[%s1411_s26 + $0x28] sm:$0xff]   ;;  %s762_s8 = sshll.u32 %s596_s0, 7 }
  0x75   : > { %791 = vmatpush3.bf16.msra.mxu1 %v932_v7  ;;  %770 = vmatprep.subr.bf16.mxu0 %v933_v8  ;;  %v948_v23 = vld [vmem:[%s1411_s26 + $0xa8] sm:$0xff]   ;;  %v949_v24 = vld [vmem:[%s1411_s26 + $0x70] sm:$0xff]   ;;  %v953_v28 = vld [vmem:[%s1411_s26 + $0x78] sm:$0xff]   ;;  %p1563_p1 = scmp.ne.s32.totalorder %s1561_s3, 0 }
  0x76   : > { %792 = vmatprep.subr.bf16.mxu1 %v934_v9  ;;  %v950_v25 = vld [vmem:[%s1411_s26 + $0xf0] sm:$0xff]   ;;  %v954_v29 = vld [vmem:[%s1411_s26 + $0xf8] sm:$0xff]   ;;  %s1461_s9 = scalar_lea.hbm %s1562_s27, %s762_s8 }
  0x77   : > { %v951_v26 = vld [vmem:[%s1411_s26 + $0x30] sm:$0xff]   ;;  %v955_v30 = vld [vmem:[%s1411_s26 + $0x38] sm:$0xff]   ;;  %p1025_p10 = pnand %p1024_p2, %p1563_p1 }
  0x78   : > { %771 = vmatpush3.bf16.msra.mxu0 %v935_v10  ;;  %v952_v27 = vld [vmem:[%s1411_s26 + $0xb0] sm:$0xff]   ;;  %v956_v31 = vld [vmem:[%s1411_s26 + $0xb8] sm:$0xff]  }
  0x79   : > { %793 = vmatpush3.bf16.msra.mxu1 %v936_v11  ;;  %772 = vmatprep.subr.bf16.mxu0 %v937_v12  ;;  %v957_v32 = vld [vmem:[%s1400_s4] ss:$16 sps:$4 sm:$0xff]   ;;  %v959_v33 = vld [vmem:[%s1400_s4 + $0x4] ss:$16 sps:$4 sm:$0xff]   ;;  %v960_v34 = vld [vmem:[%s1400_s4 + $0x8] ss:$16 sps:$4 sm:$0xff]   ;;  %p1026_p7 = pneg %p1025_p10 }
  0x7a   : > { %794 = vmatprep.subr.bf16.mxu1 %v938_v13  ;;  %v962_v35 = vld [vmem:[%s1400_s4 + $0xc] ss:$16 sps:$4 sm:$0xff]   ;;  %532 = vmatprep.mubr.bf16.mxu0 %v959_v33  ;;  %s1027_s4 = sshll.u32 %s1158_s30, 4  ;;  %s1028_s4 = int_to_ptr.vmem [resolvable:$false] %s1027_s4 }
  0x7b   : > { %573 = vmatprep.mubr.bf16.mxu1 %v962_v35  ;;  %s1029_s2 = scalar_lea.vmem %s1028_s4, 512  ;;  %p1030_p13 = scmp.lt.s32.totalorder %s1456_s23, %s1028_s4 }
  0x7c   : > { %773 = vmatpush3.bf16.msra.mxu0 %v939_v14  ;;  %p1031_p5 = scmp.lt.s32.totalorder %s1029_s2, %s1023_s25 }
  0x7d   : > { %795 = vmatpush3.bf16.msra.mxu1 %v940_v15  ;;  %774 = vmatprep.subr.bf16.mxu0 %v941_v16 }
  0x7e   : > { %796 = vmatprep.subr.bf16.mxu1 %v942_v17  ;;  %p1032_p8 = por %p1031_p5, %p1030_p13 }
  0x80   : > { %775 = vmatpush3.bf16.msra.mxu0 %v943_v18  ;;  %p1033_p12 = pnand %p1032_p8, %p1026_p7 }
  0x81   : > { %797 = vmatpush3.bf16.msra.mxu1 %v944_v19  ;;  %776 = vmatprep.subr.bf16.mxu0 %v945_v20 }
  0x82   : > { %798 = vmatprep.subr.bf16.mxu1 %v946_v21 }
  0x84   : > { %777 = vmatpush3.bf16.msra.mxu0 %v947_v22 }
  0x85   : > { %799 = vmatpush3.bf16.msra.mxu1 %v948_v23  ;;  %778 = vmatprep.subr.bf16.mxu0 %v949_v24 }
  0x86   : > { %800 = vmatprep.subr.bf16.mxu1 %v950_v25 }
  0x88   : > { %779 = vmatpush3.bf16.msra.mxu0 %v951_v26 }
  0x89   : > { %801 = vmatpush3.bf16.msra.mxu1 %v952_v27  ;;  %780 = vmatprep.subr.bf16.mxu0 %v953_v28 }
  0x8a   : > { %802 = vmatprep.subr.bf16.mxu1 %v954_v29 }
  0x8c   : > { %781 = vmatpush3.bf16.msra.mxu0 %v955_v30 }
  0x8d   : > { %803 = vmatpush3.bf16.msra.mxu1 %v956_v31 }
  0x8f   : > { %533 = vmatmul.mubr.bf16.vlgmr.msra.gmra.mrb[0].mxu0 %v957_v32 }
  0x90   : > { %574 = vmatmul.mubr.bf16.vlgmr.msra.gmra.mrb[0].mxu1 %v960_v34 }
 0x162   : > { %v782_v36 = vpop.f32.mrb[0].mxu0 }
 0x163   : > { %v804_v37 = vpop.f32.mrb[0].mxu1  ;;  %v783_v38 = vpop.f32.mrb[1].mxu0 }
 0x164   : > { %v784_v39 = vadd.f32 %v783_v38, %v782_v36  ;;  %v805_v40 = vpop.f32.mrb[1].mxu1  ;;  %v785_v41 = vpop.f32.mrb[2].mxu0 }
 0x165   : > { %v806_v42 = vadd.f32 %v805_v40, %v804_v37  ;;  %v807_v43 = vpop.f32.mrb[2].mxu1  ;;  %v786_v44 = vpop.f32.mrb[3].mxu0 }
 0x166   : > { %v787_v45 = vadd.f32 %v786_v44, %v785_v41  ;;  %v808_v46 = vpop.f32.mrb[3].mxu1 }
 0x167   : > { %v576_v47 = vadd.f32 %v806_v42, %v784_v39  ;;  %v809_v48 = vadd.f32 %v808_v46, %v807_v43 }
 0x169   : > { %582 = vst [vmem:[%s218_s29] sm:$0xff] %v576_v47  ;;  %v579_v49 = vadd.f32 %v809_v48, %v787_v45 }
 0x16b   : > { %583 = vst [vmem:[%s218_s29 + $0x8] sm:$0xff] %v579_v49 }
 0x16c   : > { %1036 = shalt.err (!%p1033_p12)
}
 0x16d   : > { %s1037_s15 = scalar_lea.hbm %s1461_s9, 256  ;;  %s1041_s5 = scalar_lea.hbm %s1562_s27, 1024 }
 0x16e   : > { %p1038_p9 = scmp.ne.s32.totalorder %s1461_s9, %s1037_s15  ;;  %p1042_p3 = scmp.lt.u32.totalorder %s1461_s9, %s1562_s27 }
 0x16f   : > { %p1043_p11 = scmp.lt.u32.totalorder %s1041_s5, %s1037_s15  ;;  %p1045_p2 = scmp.lt.u32.totalorder %s1037_s15, %s1461_s9 }
 0x170   : > { %p1039_p4 = pnand %p1038_p9, %p1563_p1 }
 0x171   : > { %p1044_p6 = por %p1043_p11, %p1042_p3 }
 0x172   : > { %p1040_p0 = pneg %p1039_p4 }
 0x173   : > { %p1046_p10 = por %p1045_p2, %p1044_p6 }
 0x175   : > { %p1047_p7 = pnand %p1046_p10, %p1040_p0 }
 0x177   : > { %1050 = shalt.err (!%p1047_p7)
}
 0x178   : > { %s1159_s29 = smov 128   ;;  %s1160_s8 = smov 256  }
 0x179   : > { %s1161_s16 = smov 8  }
 0x17a   : > { %814 = dma.vmem_to_hbm [thread:$0]  (%p1563_p1), %s1456_s23, 256, %s1461_s9, %s585_s28, %s1159_s29, %s1160_s8, %s1161_s16  }
 0x17b PF: > { %s1564_s12 = sld [smem:[#allocation11_spill]]  ;;  %s1565_s25 = sld [smem:[#allocation15_spill]] }
 0x17c   : > { %p828_p13 = scmp.ge.s32.totalorder %s1149_s19, 2 }
 0x181   : > { %s614_s30 = sand.u32 1, %s1564_s12   ;;  %p1566_p5 = scmp.ne.s32.totalorder %s1565_s25, 0 }
 0x182   : > { %s615_s4 = scalar_lea.sflag [#allocation4], %s614_s30 }
 0x183   : > { %p824_p8 = pnand %p828_p13, %p1566_p5 }
 0x185   : > { %1104 = dma.done.wait (!%p824_p8), %s615_s4, 256  }
 0x186   : > { %1106 = vsyncadd (!%p824_p8), %s615_s4, 4294967040  ;;  %s21_s19 = sadd.s32 1, %s1149_s19   ;;  %s1567_s6 = sld [smem:[#allocation13_spill]] }
 0x187   : > { %p18_p12 = scmp.ge.s32.totalorder %s21_s19, 6   ;;  %s1568_s9 = smov %s1113_s10 }
 0x188   : > { %s1569_s10 = smov %s1117_s11  ;;  %s1570_s11 = smov %s1350_s7 }
 0x189   : > { %s1571_s12 = smov %s1125_s13  ;;  %s1572_s13 = smov %s1129_s14 }
 0x18a   : > { %s1573_s14 = smov %s1347_s20  ;;  %s1574_s15 = smov %s1141_s17 }
 0x18b   : > { %s1575_s16 = smov %s1145_s18  ;;  %s1577_s18 = smov %s1583_s21 }
 0x18c   : > { %s1576_s17 = smov %s1567_s6  ;;  %20 = sbr.rel (!%p18_p12) target bundleno = 14 (0xe), region = 86 }
 0x193   :  { %620 = vsyncpa [#allocation3], 1 }
 0x194   :  { %622 = vsyncpa [#allocation3 + $0x1], 1 }
 0x195   :  { %623 = vsyncpa [#allocation6], 1 }
 0x196   :  { %625 = vsyncpa [#allocation6 + $0x1], 1 }
 0x197   :  { %626 = vsyncpa [#allocation4], 1 }
 0x198   :  { %628 = vsyncpa [#allocation4 + $0x1], 1 }

</bundles_post_ra>
